<compile_context>
chip_gen: v7x
topology: tpu7x:2x2x1
jax: 0.10.0
libtpu: 0.0.40
codegen_flags: <defaults>
</compile_context>

<pallas_src>
import functools

import jax
import jax.numpy as jnp
from jax import lax
from jax.experimental import pallas as pl
from jax.experimental.pallas import tpu as pltpu


def _decoder_global_kernel(x_ref, z_ref, w1_ref, b1_ref, w2_ref, b2_ref, out_ref, *,
                           x_s_dim, x_dim_len, z_dim, normalize, kernel_size,
                           compute_dtype):
    """One batch block.

    x_ref : (BB, Cx, T)   native NCL layout, native dtype
    z_ref : (BB, Cz, T)   native NCL layout, native dtype
    w*_ref: (C_out, K*C_in)  taps folded into the contraction dim, compute_dtype
    b*_ref: (1, C_out, 1)    f32
    out   : (BB, 1, C_last)  f32
    """
    T = x_ref.shape[2]
    BB = x_ref.shape[0]
    K = kernel_size
    pad = (K - 1) // 2

    # Channel-window select: a static slice of the VMEM tile (no extra HBM pass).
    a = x_ref[:, x_s_dim:x_s_dim + x_dim_len, :].astype(jnp.float32)      # (BB, C_in, T)
    if normalize:
        # x = x - x.mean(dim=2, keepdim=True): per-(batch, channel) time mean (lane reduce).
        a = a - jnp.mean(a, axis=2, keepdims=True)

    # Time-boundary 0/1 masks for the K-1 nonzero taps; built once, shared by both layers.
    t = lax.broadcasted_iota(jnp.int32, (1, 1, T), 2)
    masks = {}
    for k in range(K):
        d = k - pad
        if d != 0:
            masks[d] = (((t + d) >= 0) & ((t + d) < T)).astype(jnp.float32)

    def shift_stack(h):
        # (BB, C, T) -> (BB, K*C, T).  Taps stacked k-major (matches the weight reshape).
        # Rolls are along the time (lane) axis of each row, so there is no cross-batch
        # wraparound by construction; only the time boundary needs masking (one multiply).
        cols = []
        for k in range(K):
            d = k - pad
            if d == 0:
                cols.append(h)
            else:
                r = pltpu.roll(h, shift=(-d) % T, axis=2)   # r[..., t] = h[..., (t + d) % T]
                cols.append(r * masks[d])
        return jnp.concatenate(cols, axis=1)

    def conv_relu(h, w_ref, b_ref):
        # Conv1d(padding=(K-1)//2) + bias + ReLU with all K taps folded into ONE matmul:
        # per batch row (C_out, K*C_in) @ (K*C_in, T).  Bias added once in the epilogue.
        # Dropout == identity (eval mode).
        xs = shift_stack(h).astype(compute_dtype)                          # (BB, K*C, T)
        w = jnp.broadcast_to(w_ref[...].astype(compute_dtype),
                             (BB,) + w_ref.shape)                          # (BB, C_out, K*C)
        o = lax.dot_general(w, xs,
                            dimension_numbers=(((2,), (1,)), ((0,), (0,))),
                            preferred_element_type=jnp.float32)            # (BB, C_out, T)
        return jnp.maximum(o + b_ref[...], 0.0)

    h = conv_relu(a, w1_ref, b1_ref)                                       # (BB, C1, T)
    h = conv_relu(h, w2_ref, b2_ref)                                       # (BB, C2, T)

    # Fused z-gating + time mean: out[b, c] = (1/T) * sum_t h[b, c, t] * z[b, z_dim, t]
    zf = z_ref[:, z_dim:z_dim + 1, :].astype(jnp.float32)                  # (BB, 1, T)
    pooled = jnp.sum(h * zf, axis=2) * (1.0 / T)                           # (BB, C2)
    out_ref[...] = pooled[:, None, :].astype(out_ref.dtype)


def _pick_batch_block(B, Cx, T, *, target_block_bytes=4 << 20):
    """Batch rows per grid step, sized by the PADDED VMEM footprint of the x block."""
    row_bytes = (-(-Cx // 8) * 8) * (-(-T // 128) * 128) * 4     # padded f32 bytes / row
    bb = max(1, target_block_bytes // row_bytes)
    bb = int(min(bb, B))
    # Keep >= 2 grid steps when possible so both v7x TensorCores get work (one extra
    # ~0.35 us grid step is noise on v5e/v6e).
    if bb >= B and B > 1:
        bb = -(-B // 2)
    return int(bb)


def _vmem_limit_bytes(BB, Cx, Cz, c_in, c1, c2, K, T):
    """Rough padded-bytes budget: double-buffered inputs + single-buffered intermediates."""
    def padded(c):
        return BB * (-(-c // 8) * 8) * (-(-T // 128) * 128) * 4
    est = 2 * (padded(Cx) + padded(Cz))                       # pipelined inputs (x2 buffers)
    est += padded(c_in) + padded(K * c_in)                    # normalized + stacked layer-1 in
    est += padded(c1) + padded(K * c1) + 2 * padded(c2)       # layer-1 out, stacked, layer-2
    est += 2 << 20                                            # weights / biases / headroom
    # >= default scoped limit, but stay safely under v7x's 64 MiB physical VMEM.
    return int(min(max(est, 32 * 1024 * 1024), 56 * 1024 * 1024))


def decoder_global_forward_pool(x, z, params, *, x_s_dim, x_dim_len, z_dim,
                                kernel_size, normalize_trial_time=True,
                                compute_dtype=jnp.float32, batch_block=None):
    """x: (B, Cx, T), z: (B, Cz, T) in native PyTorch NCL layout (not copied / not transposed).

    Returns (B, channels[-1]) f32, matching DecoderGlobal.forward with which_forward='pool'.

    compute_dtype: dtype of the MXU matmul operands (cast inside the kernel at the dot).
                   f32 default (v5e-safe); jnp.bfloat16 is a v6e/v7x option.
    batch_block:   batch rows per grid step (default sized by padded VMEM bytes).
    """
    B, Cx, T = x.shape
    Cz = z.shape[1]
    (w1_t, b1), (w2_t, b2) = params   # torch layout: w (C_out, C_in, K), b (C_out,)
    K = kernel_size
    C1, C2 = w1_t.shape[0], w2_t.shape[0]

    # Weight re-layout only (a few KB, done once): fold taps into the contraction dim.
    # W[o, k*C_in + i] = w[o, i, k]  -> matches the k-major stacking inside the kernel.
    w1f = jnp.transpose(w1_t, (0, 2, 1)).reshape(C1, K * x_dim_len).astype(compute_dtype)
    w2f = jnp.transpose(w2_t, (0, 2, 1)).reshape(C2, K * C1).astype(compute_dtype)
    b1r = b1.reshape(1, C1, 1).astype(jnp.float32)
    b2r = b2.reshape(1, C2, 1).astype(jnp.float32)

    BB = batch_block if batch_block is not None else _pick_batch_block(B, Cx, T)
    BB = int(min(BB, B))
    grid = pl.cdiv(B, BB)   # ragged last block is clipped by Pallas; no wrapper padding pass

    kernel = functools.partial(
        _decoder_global_kernel,
        x_s_dim=x_s_dim, x_dim_len=x_dim_len, z_dim=z_dim,
        normalize=normalize_trial_time, kernel_size=kernel_size,
        compute_dtype=compute_dtype)

    out = pl.pallas_call(
        kernel,
        out_shape=jax.ShapeDtypeStruct((B, 1, C2), jnp.float32),
        grid_spec=pltpu.PrefetchScalarGridSpec(
            num_scalar_prefetch=0,
            grid=(grid,),
            in_specs=[
                # native layouts; full channel slabs so the trailing-two-dims constraint is
                # trivially satisfied and no wrapper copy is needed.
                pl.BlockSpec((BB, Cx, T), lambda i: (i, 0, 0)),
                pl.BlockSpec((BB, Cz, T), lambda i: (i, 0, 0)),
                pl.BlockSpec((C1, K * x_dim_len), lambda i: (0, 0)),
                pl.BlockSpec((1, C1, 1), lambda i: (0, 0, 0)),
                pl.BlockSpec((C2, K * C1), lambda i: (0, 0)),
                pl.BlockSpec((1, C2, 1), lambda i: (0, 0, 0)),
            ],
            out_specs=pl.BlockSpec((BB, 1, C2), lambda i: (i, 0, 0)),
        ),
        compiler_params=pltpu.CompilerParams(
            dimension_semantics=("parallel",),
            vmem_limit_bytes=_vmem_limit_bytes(BB, Cx, Cz, x_dim_len, C1, C2, K, T)),
    )(x, z, w1f, b1r, w2f, b2r)
    return out.reshape(B, C2)


def reference_forward_pool(x, z, params, *, x_s_dim, x_dim_len, z_dim,
                           kernel_size, normalize_trial_time=True):
    """Pure-JAX reference matching the PyTorch forward_pool semantics."""
    pad = (kernel_size - 1) // 2
    if normalize_trial_time:
        x = x - x.mean(axis=2, keepdims=True)
    h = x[:, x_s_dim:x_s_dim + x_dim_len, :]
    zp = z[:, z_dim:z_dim + 1, :]
    for w, b in params:
        h = lax.conv_general_dilated(h, w, window_strides=(1,), padding=[(pad, pad)],
                                     dimension_numbers=('NCH', 'OIH', 'NCH'))
        h = h + b[None, :, None]
        h = jnp.maximum(h, 0.0)
    h = h * zp
    return h.mean(axis=2)


if __name__ == "__main__":
    key = jax.random.PRNGKey(0)
    B, Cx, Cz, T = 2, 6, 3, 16
    x_s_dim, x_dim_len, z_dim = 1, 4, 1
    channels = [8, 8]
    kernel_size = 3

    k1, k2, k3, k4, k5, k6, k7, k8 = jax.random.split(key, 8)
    x = jax.random.normal(k1, (B, Cx, T), jnp.float32)
    z = jax.random.normal(k2, (B, Cz, T), jnp.float32)
    # deterministic synthetic Conv1d parameters (torch layout: (C_out, C_in, K))
    w1 = jax.random.normal(k3, (channels[0], x_dim_len, kernel_size), jnp.float32) * 0.2
    b1 = jax.random.normal(k4, (channels[0],), jnp.float32) * 0.1
    w2 = jax.random.normal(k5, (channels[1], channels[0], kernel_size), jnp.float32) * 0.2
    b2 = jax.random.normal(k6, (channels[1],), jnp.float32) * 0.1
    params = ((w1, b1), (w2, b2))

    common = dict(x_s_dim=x_s_dim, x_dim_len=x_dim_len, z_dim=z_dim,
                  kernel_size=kernel_size, normalize_trial_time=True)

    ref = reference_forward_pool(x, z, params, **common)

    # f32 matmul path (v5e-safe default); exact check.
    out = jax.block_until_ready(decoder_global_forward_pool(x, z, params, **common))
    assert out.shape == (B, channels[-1]), out.shape
    assert jnp.allclose(out, ref, atol=1e-4, rtol=1e-4), (out, ref)

    # bf16 at the MXU operands only (x stays f32 through normalization); loose check.
    out_bf16 = jax.block_until_ready(
        decoder_global_forward_pool(x, z, params, compute_dtype=jnp.bfloat16, **common))
    assert jnp.allclose(out_bf16, ref, atol=5e-2, rtol=5e-2), (out_bf16, ref)

    # Multi-step grid with evenly dividing batch blocks (B=8, BB=4 -> 2 grid steps).
    xb = jax.random.normal(k7, (8, Cx, T), jnp.float32)
    zb = jax.random.normal(k8, (8, Cz, T), jnp.float32)
    refb = reference_forward_pool(xb, zb, params, **common)
    outb = jax.block_until_ready(
        decoder_global_forward_pool(xb, zb, params, batch_block=4, **common))
    assert outb.shape == (8, channels[-1]), outb.shape
    assert jnp.allclose(outb, refb, atol=1e-4, rtol=1e-4), (outb, refb)

    # Ragged grid: B=6 with BB=4 -> cdiv grid of 2, last block clipped (no wrapper padding).
    xr, zr = xb[:6], zb[:6]
    refr = reference_forward_pool(xr, zr, params, **common)
    outr = jax.block_until_ready(
        decoder_global_forward_pool(xr, zr, params, batch_block=4, **common))
    assert outr.shape == (6, channels[-1]), outr.shape
    assert jnp.allclose(outr, refr, atol=1e-4, rtol=1e-4), (outr, refr)

    print("KERNEL_OK")
</pallas_src>

<mosaic_0001>
module attributes {stable_mosaic.version = 11 : i64} {
  func.func @_decoder_global_kernel(%arg0: i32, %arg1: memref<1x6x16xf32, #tpu.memory_space<vmem>>, %arg2: memref<1x3x16xf32, #tpu.memory_space<vmem>>, %arg3: memref<8x12xf32, #tpu.memory_space<vmem>>, %arg4: memref<1x8x1xf32, #tpu.memory_space<vmem>>, %arg5: memref<8x24xf32, #tpu.memory_space<vmem>>, %arg6: memref<1x8x1xf32, #tpu.memory_space<vmem>>, %arg7: memref<1x1x8xf32, #tpu.memory_space<vmem>>) attributes {dimension_semantics = [#tpu.dimension_semantics<parallel>], iteration_bounds = array<i64: 2>, scalar_prefetch = 0 : i64, scratch_operands = 0 : i64, tpu.core_type = #tpu.core_type<tc>, window_params = [{transform_indices = @transform_0, window_bounds = array<i64: 1, 6, 16>}, {transform_indices = @transform_1, window_bounds = array<i64: 1, 3, 16>}, {pipeline_mode = #tpu.pipeline_mode<synchronous>, transform_indices = @transform_2, window_bounds = array<i64: 8, 12>}, {pipeline_mode = #tpu.pipeline_mode<synchronous>, transform_indices = @transform_3, window_bounds = array<i64: 1, 8, 1>}, {pipeline_mode = #tpu.pipeline_mode<synchronous>, transform_indices = @transform_4, window_bounds = array<i64: 8, 24>}, {pipeline_mode = #tpu.pipeline_mode<synchronous>, transform_indices = @transform_5, window_bounds = array<i64: 1, 8, 1>}, {transform_indices = @transform_6, window_bounds = array<i64: 1, 1, 8>}]} {
    %c0 = arith.constant 0 : index
    %c1 = arith.constant 1 : index
    %c0_0 = arith.constant 0 : index
    %0 = vector.load %arg1[%c0, %c1, %c0_0] : memref<1x6x16xf32, #tpu.memory_space<vmem>>, vector<1x4x16xf32>
    %cst = arith.constant dense<0.000000e+00> : vector<1x4xf32>
    %1 = vector.multi_reduction <add>, %0, %cst [2] : vector<1x4x16xf32> to vector<1x4xf32>
    %2 = vector.shape_cast %1 : vector<1x4xf32> to vector<1x4x1xf32>
    %cst_1 = arith.constant 1.600000e+01 : f32
    %3 = vector.broadcast %cst_1 : f32 to vector<1x4x1xf32>
    %4 = arith.divf %2, %3 : vector<1x4x1xf32>
    %5 = vector.broadcast %4 : vector<1x4x1xf32> to vector<1x4x16xf32>
    %6 = arith.subf %0, %5 : vector<1x4x16xf32>
    %7 = tpu.iota {dimensions = array<i32: 2>} : vector<1x1x16xi32>
    %c-1_i32 = arith.constant -1 : i32
    %8 = vector.broadcast %c-1_i32 : i32 to vector<1x1x16xi32>
    %9 = arith.addi %7, %8 : vector<1x1x16xi32>
    %c0_i32 = arith.constant 0 : i32
    %10 = vector.broadcast %c0_i32 : i32 to vector<1x1x16xi32>
    %11 = arith.cmpi sge, %9, %10 : vector<1x1x16xi32>
    %c-1_i32_2 = arith.constant -1 : i32
    %12 = vector.broadcast %c-1_i32_2 : i32 to vector<1x1x16xi32>
    %13 = arith.addi %7, %12 : vector<1x1x16xi32>
    %c16_i32 = arith.constant 16 : i32
    %14 = vector.broadcast %c16_i32 : i32 to vector<1x1x16xi32>
    %15 = arith.cmpi slt, %13, %14 : vector<1x1x16xi32>
    %16 = arith.andi %11, %15 : vector<1x1x16xi1>
    %17 = arith.extui %16 : vector<1x1x16xi1> to vector<1x1x16xi32>
    %18 = arith.sitofp %17 : vector<1x1x16xi32> to vector<1x1x16xf32>
    %c1_i32 = arith.constant 1 : i32
    %19 = vector.broadcast %c1_i32 : i32 to vector<1x1x16xi32>
    %20 = arith.addi %7, %19 : vector<1x1x16xi32>
    %c0_i32_3 = arith.constant 0 : i32
    %21 = vector.broadcast %c0_i32_3 : i32 to vector<1x1x16xi32>
    %22 = arith.cmpi sge, %20, %21 : vector<1x1x16xi32>
    %c1_i32_4 = arith.constant 1 : i32
    %23 = vector.broadcast %c1_i32_4 : i32 to vector<1x1x16xi32>
    %24 = arith.addi %7, %23 : vector<1x1x16xi32>
    %c16_i32_5 = arith.constant 16 : i32
    %25 = vector.broadcast %c16_i32_5 : i32 to vector<1x1x16xi32>
    %26 = arith.cmpi slt, %24, %25 : vector<1x1x16xi32>
    %27 = arith.andi %22, %26 : vector<1x1x16xi1>
    %28 = arith.extui %27 : vector<1x1x16xi1> to vector<1x1x16xi32>
    %29 = arith.sitofp %28 : vector<1x1x16xi32> to vector<1x1x16xf32>
    %c1_i32_6 = arith.constant 1 : i32
    %30 = tpu.dynamic_rotate %6 by %c1_i32_6 dim 2 : vector<1x4x16xf32>, i32 -> vector<1x4x16xf32>
    %31 = vector.broadcast %18 : vector<1x1x16xf32> to vector<1x4x16xf32>
    %32 = arith.mulf %30, %31 : vector<1x4x16xf32>
    %c15_i32 = arith.constant 15 : i32
    %33 = tpu.dynamic_rotate %6 by %c15_i32 dim 2 : vector<1x4x16xf32>, i32 -> vector<1x4x16xf32>
    %34 = vector.broadcast %29 : vector<1x1x16xf32> to vector<1x4x16xf32>
    %35 = arith.mulf %33, %34 : vector<1x4x16xf32>
    %36 = tpu.concatenate %32, %6, %35 in 1 : vector<1x4x16xf32>, vector<1x4x16xf32>, vector<1x4x16xf32> -> vector<1x12x16xf32>
    %c0_7 = arith.constant 0 : index
    %c0_8 = arith.constant 0 : index
    %37 = vector.load %arg3[%c0_7, %c0_8] : memref<8x12xf32, #tpu.memory_space<vmem>>, vector<8x12xf32>
    %38 = vector.shape_cast %37 : vector<8x12xf32> to vector<1x8x12xf32>
    %cst_9 = arith.constant dense<0.000000e+00> : vector<1x8x16xf32>
    %39 = tpu.matmul %38, %36, %cst_9 {dimension_numbers = #tpu.dot_dimension_numbers<[2], [1], [1], [2], [0, 0, 0, 1, 1, 2], [0], [0]>} : vector<1x8x12xf32>, vector<1x12x16xf32>, vector<1x8x16xf32> -> vector<1x8x16xf32>
    %c0_10 = arith.constant 0 : index
    %c0_11 = arith.constant 0 : index
    %c0_12 = arith.constant 0 : index
    %40 = vector.load %arg4[%c0_10, %c0_11, %c0_12] : memref<1x8x1xf32, #tpu.memory_space<vmem>>, vector<1x8x1xf32>
    %41 = vector.broadcast %40 : vector<1x8x1xf32> to vector<1x8x16xf32>
    %42 = arith.addf %39, %41 : vector<1x8x16xf32>
    %cst_13 = arith.constant 0.000000e+00 : f32
    %43 = vector.broadcast %cst_13 : f32 to vector<1x8x16xf32>
    %44 = arith.maximumf %42, %43 : vector<1x8x16xf32>
    %c1_i32_14 = arith.constant 1 : i32
    %45 = tpu.dynamic_rotate %44 by %c1_i32_14 dim 2 : vector<1x8x16xf32>, i32 -> vector<1x8x16xf32>
    %46 = vector.broadcast %18 : vector<1x1x16xf32> to vector<1x8x16xf32>
    %47 = arith.mulf %45, %46 : vector<1x8x16xf32>
    %c15_i32_15 = arith.constant 15 : i32
    %48 = tpu.dynamic_rotate %44 by %c15_i32_15 dim 2 : vector<1x8x16xf32>, i32 -> vector<1x8x16xf32>
    %49 = vector.broadcast %29 : vector<1x1x16xf32> to vector<1x8x16xf32>
    %50 = arith.mulf %48, %49 : vector<1x8x16xf32>
    %51 = tpu.concatenate %47, %44, %50 in 1 : vector<1x8x16xf32>, vector<1x8x16xf32>, vector<1x8x16xf32> -> vector<1x24x16xf32>
    %c0_16 = arith.constant 0 : index
    %c0_17 = arith.constant 0 : index
    %52 = vector.load %arg5[%c0_16, %c0_17] : memref<8x24xf32, #tpu.memory_space<vmem>>, vector<8x24xf32>
    %53 = vector.shape_cast %52 : vector<8x24xf32> to vector<1x8x24xf32>
    %cst_18 = arith.constant dense<0.000000e+00> : vector<1x8x16xf32>
    %54 = tpu.matmul %53, %51, %cst_18 {dimension_numbers = #tpu.dot_dimension_numbers<[2], [1], [1], [2], [0, 0, 0, 1, 1, 2], [0], [0]>} : vector<1x8x24xf32>, vector<1x24x16xf32>, vector<1x8x16xf32> -> vector<1x8x16xf32>
    %c0_19 = arith.constant 0 : index
    %c0_20 = arith.constant 0 : index
    %c0_21 = arith.constant 0 : index
    %55 = vector.load %arg6[%c0_19, %c0_20, %c0_21] : memref<1x8x1xf32, #tpu.memory_space<vmem>>, vector<1x8x1xf32>
    %56 = vector.broadcast %55 : vector<1x8x1xf32> to vector<1x8x16xf32>
    %57 = arith.addf %54, %56 : vector<1x8x16xf32>
    %cst_22 = arith.constant 0.000000e+00 : f32
    %58 = vector.broadcast %cst_22 : f32 to vector<1x8x16xf32>
    %59 = arith.maximumf %57, %58 : vector<1x8x16xf32>
    %c0_23 = arith.constant 0 : index
    %c1_24 = arith.constant 1 : index
    %c0_25 = arith.constant 0 : index
    %60 = vector.load %arg2[%c0_23, %c1_24, %c0_25] : memref<1x3x16xf32, #tpu.memory_space<vmem>>, vector<1x1x16xf32>
    %61 = vector.broadcast %60 : vector<1x1x16xf32> to vector<1x8x16xf32>
    %62 = arith.mulf %59, %61 : vector<1x8x16xf32>
    %cst_26 = arith.constant dense<0.000000e+00> : vector<1x8xf32>
    %63 = vector.multi_reduction <add>, %62, %cst_26 [2] : vector<1x8x16xf32> to vector<1x8xf32>
    %cst_27 = arith.constant 6.250000e-02 : f32
    %64 = vector.broadcast %cst_27 : f32 to vector<1x8xf32>
    %65 = arith.mulf %63, %64 : vector<1x8xf32>
    %66 = vector.shape_cast %65 : vector<1x8xf32> to vector<1x1x8xf32>
    %c0_28 = arith.constant 0 : index
    %c0_29 = arith.constant 0 : index
    %c0_30 = arith.constant 0 : index
    %67 = vector.load %arg7[%c0_28, %c0_29, %c0_30] : memref<1x1x8xf32, #tpu.memory_space<vmem>>, vector<1x1x8xf32>
    tpu.vector_store %arg7[%c0_28, %c0_29, %c0_30], %66 {strides = array<i32>} : memref<1x1x8xf32, #tpu.memory_space<vmem>>, vector<1x1x8xf32>,
    return
  }
  func.func @transform_0(%arg0: i32) -> (i32, i32, i32) {
    %c0_i32 = arith.constant 0 : i32
    %c0_i32_0 = arith.constant 0 : i32
    %c0_i32_1 = arith.constant 0 : i32
    return %arg0, %c0_i32, %c0_i32_0 : i32, i32, i32
  }
  func.func @transform_1(%arg0: i32) -> (i32, i32, i32) {
    %c0_i32 = arith.constant 0 : i32
    %c0_i32_0 = arith.constant 0 : i32
    %c0_i32_1 = arith.constant 0 : i32
    return %arg0, %c0_i32, %c0_i32_0 : i32, i32, i32
  }
  func.func @transform_2(%arg0: i32) -> (i32, i32) {
    %c0_i32 = arith.constant 0 : i32
    %c0_i32_0 = arith.constant 0 : i32
    %c0_i32_1 = arith.constant 0 : i32
    return %c0_i32, %c0_i32_0 : i32, i32
  }
  func.func @transform_3(%arg0: i32) -> (i32, i32, i32) {
    %c0_i32 = arith.constant 0 : i32
    %c0_i32_0 = arith.constant 0 : i32
    %c0_i32_1 = arith.constant 0 : i32
    %c0_i32_2 = arith.constant 0 : i32
    return %c0_i32, %c0_i32_0, %c0_i32_1 : i32, i32, i32
  }
  func.func @transform_4(%arg0: i32) -> (i32, i32) {
    %c0_i32 = arith.constant 0 : i32
    %c0_i32_0 = arith.constant 0 : i32
    %c0_i32_1 = arith.constant 0 : i32
    return %c0_i32, %c0_i32_0 : i32, i32
  }
  func.func @transform_5(%arg0: i32) -> (i32, i32, i32) {
    %c0_i32 = arith.constant 0 : i32
    %c0_i32_0 = arith.constant 0 : i32
    %c0_i32_1 = arith.constant 0 : i32
    %c0_i32_2 = arith.constant 0 : i32
    return %c0_i32, %c0_i32_0, %c0_i32_1 : i32, i32, i32
  }
  func.func @transform_6(%arg0: i32) -> (i32, i32, i32) {
    %c0_i32 = arith.constant 0 : i32
    %c0_i32_0 = arith.constant 0 : i32
    %c0_i32_1 = arith.constant 0 : i32
    return %arg0, %c0_i32, %c0_i32_0 : i32, i32, i32
  }
}

</mosaic_0001>

<bundles_post_ra>
// kernel: tpu_custom_call.1
= control target key start
LH: loop header
LB: loop body
LE: loop exit
PB: predicated region body
PF: predicated region fallthrough
CT: control target
= control target key end

     0   :  { %11 = vsyncpa [#allocation3], 0  ;;  %s976_s0 = inlined_call_operand.vmem [shape: f32[2,6,16], index: 0, kind: input, shape index: {}]   ;;  %s977_s1 = inlined_call_operand.vmem [shape: f32[2,3,16], index: 1, kind: input, shape index: {}]   ;;  %s978_s2 = inlined_call_operand.vmem [shape: f32[8,12], index: 2, kind: input, shape index: {}]   ;;  %s979_s3 = inlined_call_operand.vmem [shape: f32[1,8,1], index: 3, kind: input, shape index: {}]   ;;  %s980_s4 = inlined_call_operand.vmem [shape: f32[8,24], index: 4, kind: input, shape index: {}]   ;;  %s981_s5 = inlined_call_operand.vmem [shape: f32[1,8,1], index: 5, kind: input, shape index: {}]   ;;  %s982_s6 = inlined_call_operand.hbm [shape: f32[2,1,8], index: 6, kind: output, shape index: {}]  }
   0x1   :  { %13 = vsyncpa [#allocation3 + $0x1], 0  ;;  %s828_s21 = smov 0   ;;  %s830_s22 = smov 0  }
   0x2   :  { %s832_s23 = smov 0   ;;  %s834_s24 = smov 0  }
   0x3 LB: > { %s849_s25 = sadd.s32 4294967295, %s780_s24   ;;  %s607_s26 = sadd.s32 4294967294, %s780_s24   ;;  %s780_s24 = sphi %s834_s24, %s988_s24   ;;  %s776_s23 = sphi %s832_s23, %s987_s23   ;;  %s772_s22 = sphi %s830_s22, %s986_s22   ;;  %s768_s21 = sphi %s828_s21, %s985_s21  }
   0x4   : > { %s853_s27 = sadd.s32 1, %s780_s24   ;;  %s162_s28 = sadd.s32 1, %s776_s23 }
   0x5   : > { %s159_s29 = ssub.s32 %s780_s24, %s853_s27  ;;  %p172_p0 = scmp.ne.s32.totalorder %s776_s23, %s772_s22 }
   0x6   : > { %p160_p1 = scmp.eq.s32.totalorder %s159_s29, 0  ;;  %p173_p2 = scmp.eq.s32.totalorder %s849_s25, 1 }
   0x7   : > { %p178_p3 = scmp.ne.s32.totalorder %s772_s22, %s768_s21  ;;  %p179_p4 = scmp.eq.s32.totalorder %s607_s26, 1 }
   0x8   : > { %s864_s30 = scalar_select %p160_p1, %s776_s23, %s162_s28  }
   0x9   : > { %p866_p5 = por %p173_p2, %p172_p0  ;;  %p870_p6 = por %p179_p4, %p178_p3 }
   0xa   : > { %p610_p7 = scmp.ge.s32.totalorder %s780_s24, 1  ;;  %p223_p8 = scmp.lt.s32.totalorder %s780_s24, 3 }
   0xc   : > { %p224_p9 = pnand %p610_p7, %p223_p8 }
   0xd   : > { %p255_p10 = scmp.lt.s32.totalorder (!%p224_p9), %s849_s25, 1  ;;  %vm264_vm0 = vcmask (!%p224_p9), 125952   ;;  %s782_s14 = smov (!%p224_p9), 16   ;;  %v271_v5 = vlaneseq (!%p224_p9)  ;;  %vm285_vm1 = vcmask (!%p224_p9), 1047680   ;;  %v783_v11 = vmov (!%p224_p9), 0.0   ;;  %v313_v29 = vld [vmem:[%s979_s3] sm:$0xff] (!%p224_p9) }
   0xe   : > { %227 = sbr.rel (%p224_p9) target bundleno = 1709 (0x6ad), region = 44  ;;  %s784_s15 = smov (!%p224_p9), 1   ;;  %v787_v22 = vmov (!%p224_p9), 0.0|0.0   ;;  %vm788_vm6 = vmmov (!%p224_p9), 0   ;;  %vm310_vm7 = vcmask (!%p224_p9), 1043456   ;;  %v789_v25 = vmov (!%p224_p9), 0  }
   0xf   : > { %v886_v6 = vand.u32 (!%p224_p9), 127, %v271_v5  ;;  %s785_s16 = smov (!%p224_p9), 15   ;;  %s786_s17 = smov (!%p224_p9), 14   ;;  %645 = vmatprep.subr.bf16.mxu0 (!%p224_p9), %v787_v22  ;;  %649 = vmatprep.subr.bf16.mxu1 (!%p224_p9), %v787_v22  ;;  %vm791_vm8 = vmmov (!%p224_p9), 1   ;;  %v312_v34 = vld [vmem:[%s978_s2] sm:$0xff] (!%p224_p9)  ;;  %vm325_vm10 = vcmask (!%p224_p9), 97280  }
  0x10   : > { %633 = vmatprep.mubr.msk.f32.mxu0 (!%p224_p9), %vm788_vm6, %v783_v11  ;;  %642 = vmatprep.mubr.msk.f32.mxu1 (!%p224_p9), %vm788_vm6, %v783_v11  ;;  %s790_s18 = smov (!%p224_p9), 113   ;;  %vm647_vm9 = vmpackc.low (!%p224_p9), %vm310_vm7, %vm791_vm8  ;;  %v417_v48 = vld [vmem:[%s981_s5] sm:$0xff] (!%p224_p9)  ;;  %vm433_vm11 = vcmask (!%p224_p9), 195584   ;;  %vm514_vm12 = vcmask (!%p224_p9), 130048   ;;  %vm525_vm13 = vcmask (!%p224_p9), 57344  }
  0x11   : > { %v273_v7 = vadd.s32 (!%p224_p9), 4294967295, %v886_v6  ;;  %v279_v8 = vadd.s32 (!%p224_p9), 1, %v886_v6  ;;  %711 = vset.pattern.permute.xlu1 (!%p224_p9), %v789_v25  ;;  %717 = vset.pattern.permute.xlu0 (!%p224_p9), %v789_v25  ;;  %v416_v54 = vld [vmem:[%s980_s4] sm:$0xff] (!%p224_p9) }
  0x13   : > { %vm274_vm2 = vcmp.ge.s32.totalorder (!%p224_p9), %v273_v7, 0  ;;  %vm275_vm3 = vcmp.lt.s32.totalorder (!%p224_p9), %v273_v7, 16  ;;  %vm281_vm4 = vcmp.lt.s32.totalorder (!%p224_p9), %v279_v8, 16 }
  0x14   : > { %vm276_vm5 = vmand (!%p224_p9), %vm274_vm2, %vm275_vm3  ;;  %v614_v12 = vsel (!%p224_p9), %vm281_vm4, 1.0, %v783_v11 }
  0x15   : > { %s878_s9 = scalar_select %p255_p10, %s849_s25, 1  ;;  %v613_v14 = vsel %vm276_vm5, 1.0, %v783_v11 }
  0x17   : > { %s611_s10 = sshll.u32 %s878_s9, 3 }
  0x18   : > { %s258_s13 = scalar_lea.vmem %s976_s0, %s611_s10 }
  0x19   : > { %v263_v0 = vld [vmem:[%s258_s13 + $0x1] sm:$0xf]  ;;  %s612_s13 = sshll.u32 %s878_s9, 2  ;;  %s619_s9 = sshll.u32 %s849_s25, 4 }
  0x1a   : > { %v265_v1 = vsel %vm264_vm0, %v263_v0, 0.0  ;;  %s934_s28 = scalar_lea.hbm %s982_s6, %s619_s9  ;;  %s792_s25 = smov [#allocation2]  }
  0x1b   : > { %266 = vadd.xlane.f32.xlu0 %v265_v1  ;;  %s722_s11 = sshll.u32 %s792_s25, 4  ;;  %s723_s11 = int_to_ptr.vmem [resolvable:$false] %s722_s11 }
  0x1c   : > { %s724_s12 = scalar_lea.vmem %s723_s11, 32 }
  0xa8   : > { %v267_v2 = vpop.xlane.xlu0 %266 }
  0xa9   : > { %v269_v3 = vmul.f32 0.0625, %v267_v2 }
  0xab   : > { %v270_v4 = vsub.f32 %v263_v0, %v269_v3  ;;  %v521_v0 = vshrl.u32 %v271_v5, 7 }
  0xad   : > { %286 = vrot.lane.b32.xlu0 %v270_v4, %s782_s14  ;;  %v303_v13 = vrot.slane %v270_v4, 4  ;;  %v522_v1 = vsub.s32 %v886_v6, %v521_v0 }
  0xaf   : > { %v701_v15 = vpack.i.bf16 %v303_v13, %v613_v14 }
 0x11f   : > { %v287_v9 = vpop.permute.xlu0 %286 }
 0x120   : > { %v288_v10 = vsel %vm285_vm1, %v287_v9, %v270_v4 }
 0x121   : > { %289 = vrot.lane.b32.xlu1 %v288_v10, %s782_s14 }
 0x125   : > { %298 = vrot.lane.b32.xlu1 %v614_v12, %s784_s15 }
 0x129   : > { %702 = vrot.lane.b32.xlu1 %v701_v15, %s785_s16 }
 0x193   : > { %v290_v16 = vpop.permute.xlu1 %289 }
 0x194   : > { %v291_v17 = vsel %vm285_vm1, %v290_v16, %v270_v4 }
 0x197   : > { %v299_v18 = vpop.permute.xlu1 %298 }
 0x198   : > { %v301_v19 = vmul.f32 %v299_v18, %v291_v17 }
 0x19a   : > { %308 = vrot.lane.b32.xlu1 %v301_v19, %s786_s17 }
 0x19b   : > { %v703_v20 = vpop.permute.xlu1 %702 }
 0x19c   : > { %v704_v21 = vunpack.i.l.bf16 %v703_v20  ;;  %v705_v24 = vunpack.i.h.bf16 %v703_v20 }
 0x19e   : > { %v296_v23 = vmul.f32 %v704_v21, %v291_v17 }
 0x1a0   : > { %v311_v27 = vsel %vm310_vm7, %v296_v23, %v705_v24 }
 0x20c   : > { %v309_v26 = vpop.permute.xlu1 %308 }
 0x20d   : > { %v706_v28 = vpack.i.bf16 %v309_v26, %v311_v27 }
 0x20f   : > { %707 = vrot.lane.b32.xlu1 %v706_v28, %s790_s18 }
 0x213   : > { %316 = vperm.xlu1 %711, %v313_v29  }
 0x281   : > { %v708_v30 = vpop.permute.xlu1 %707 }
 0x282   : > { %v710_v31 = vunpack.i.h.bf16 %v708_v30  ;;  %v709_v32 = vunpack.i.l.bf16 %v708_v30 }
 0x284   : > { %v646_v33 = vpack.c.bf16 %v710_v31, %v709_v32 }
 0x286   : > { %648 = vmatpush3.bf16.msk.msra.mxu0 %vm647_vm9, %v646_v33 }
 0x289   : > { %634 = vmatmul.mubr.msk.f32.vlgmr.msra.gmra.mrb[0].mxu0 %vm325_vm10, %v312_v34 }
 0x292   : > { %v317_v35 = vpop.permute.xlu1 %316 }
 0x35c   : > { %v397_v36 = vpop.f32.mrb[0].mxu0 }
 0x35d   : > { %v398_v37 = vadd.f32 %v397_v36, %v317_v35  ;;  %v635_v38 = vpop.f32.mrb[1].mxu0 }
 0x35f   : > { %v401_v39 = vmax.f32 %v398_v37, 0.0 }
 0x361   : > { %402 = vrot.lane.b32.xlu1 %v401_v39, %s782_s14 }
 0x365   : > { %411 = vrot.lane.b32.xlu1 %v401_v39, %s785_s16  ;;  %s262_s16 = scalar_lea.vmem %s977_s1, %s612_s13 }
 0x366   : > { %v618_v60 = vld [vmem:[%s262_s16 + $0x1] ss:$0 sm:$0xff] }
 0x3d3   : > { %v403_v40 = vpop.permute.xlu1 %402 }
 0x3d4   : > { %v404_v41 = vsel %vm285_vm1, %v403_v40, %v401_v39 }
 0x3d5   : > { %405 = vrot.lane.b32.xlu0 %v404_v41, %s782_s14 }
 0x3d7   : > { %v412_v46 = vpop.permute.xlu1 %411 }
 0x447   : > { %v406_v42 = vpop.permute.xlu0 %405 }
 0x448   : > { %v407_v43 = vsel %vm285_vm1, %v406_v42, %v401_v39 }
 0x449   : > { %v408_v44 = vmul.f32 %v704_v21, %v407_v43  ;;  %v409_v45 = vmul.f32 %v407_v43, %v299_v18 }
 0x44b   : > { %414 = vrot.lane.b32.xlu0 %v409_v45, %s786_s17  ;;  %v712_v47 = vpack.i.bf16 %v412_v46, %v408_v44  ;;  %s253_s17 = sand.u32 1, %s772_s22  }
 0x44c   : > { %s528_s29 = scalar_lea.sflag [#allocation3], %s253_s17 }
 0x44d   : > { %713 = vrot.lane.b32.xlu1 %v712_v47, %s790_s18 }
 0x451   : > { %420 = vperm.xlu1 %711, %v417_v48  }
 0x4bd   : > { %v415_v49 = vpop.permute.xlu0 %414 }
 0x4be   : > { %428 = vrot.lane.b32.xlu0 %v415_v49, %s790_s18  ;;  %s254_s18 = scalar_lea.vmem [#allocation2], %s253_s17 }
 0x4bf   : > { %v714_v50 = vpop.permute.xlu1 %713  ;;  %s540_s19 = sshll.u32 %s254_s18, 4  ;;  %s936_s19 = int_to_ptr.vmem [resolvable:$true] %s540_s19 }
 0x4c0   : > { %v716_v51 = vunpack.i.h.bf16 %v714_v50  ;;  %v715_v52 = vunpack.i.l.bf16 %v714_v50  ;;  %s718_s10 = scalar_lea.vmem %s936_s19, 16  ;;  %p725_p0 = scmp.lt.s32.totalorder %s936_s19, %s723_s11 }
 0x4c1   : > { %p719_p11 = scmp.ne.s32.totalorder %s936_s19, %s718_s10  ;;  %p726_p1 = scmp.lt.s32.totalorder %s724_s12, %s718_s10 }
 0x4c2   : > { %v650_v53 = vpack.c.bf16 %v716_v51, %v715_v52 }
 0x4c3   : > { %p720_p12 = pnand %p719_p11, %p866_p5  ;;  %p727_p2 = por %p726_p1, %p725_p0 }
 0x4c4   : > { %651 = vmatpush3.bf16.msra.mxu1 %v650_v53 }
 0x4c5   : > { %640 = vmatprep.subr.mxu1 %v783_v11  ;;  %p721_p13 = pneg %p720_p12 }
 0x4c7   : > { %p728_p3 = pnand %p727_p2, %p721_p13 }
 0x4d0   : > { %v421_v56 = vpop.permute.xlu1 %420 }
 0x530   : > { %v429_v55 = vpop.permute.xlu0 %428 }
 0x531   : > { %641 = vmatpush3.msra.mxu1 %v429_v55 }
 0x532   : > { %643 = vmatmul.mubr.msk.f32.vlgmr.msra.gmra.mrb[0].mxu1 %vm433_vm11, %v416_v54 }
 0x605   : > { %v503_v57 = vpop.f32.mrb[0].mxu1 }
 0x606   : > { %v504_v58 = vadd.f32 %v503_v57, %v421_v56  ;;  %v644_v59 = vpop.f32.mrb[1].mxu1 }
 0x608   : > { %v507_v61 = vmax.f32 %v504_v58, 0.0 }
 0x60a   : > { %v513_v62 = vmul.f32 %v618_v60, %v507_v61 }
 0x60c   : > { %v515_v63 = vsel %vm514_vm12, %v513_v62, 0.0 }
 0x60d   : > { %516 = vadd.xlane.f32.xlu0 %v515_v63 }
 0x69a   : > { %v517_v2 = vpop.xlane.xlu0 %516 }
 0x69b   : > { %v518_v3 = vmul.f32 0.0625, %v517_v2 }
 0x69d   : > { %v523_v4 = vrot.slane %v518_v3, %v522_v1 }
 0x69f   : > { %526 = vst.msk [vmem:[%s254_s18] sm:$0x1] %vm525_vm13, %v523_v4 }
 0x6a0   : > { %731 = shalt.err (!%p728_p3)
}
 0x6a1   : > { %s732_s13 = scalar_lea.hbm %s934_s28, 16  ;;  %s736_s16 = scalar_lea.hbm %s982_s6, 32 }
 0x6a2   : > { %p733_p4 = scmp.ne.s32.totalorder %s934_s28, %s732_s13  ;;  %p737_p9 = scmp.lt.u32.totalorder %s934_s28, %s982_s6 }
 0x6a3   : > { %p738_p10 = scmp.lt.u32.totalorder %s736_s16, %s732_s13  ;;  %p740_p12 = scmp.lt.u32.totalorder %s732_s13, %s934_s28 }
 0x6a4   : > { %p734_p7 = pnand %p733_p4, %p866_p5 }
 0x6a5   : > { %p739_p11 = por %p738_p10, %p737_p9 }
 0x6a6   : > { %p735_p8 = pneg %p734_p7 }
 0x6a7   : > { %p741_p13 = por %p740_p12, %p739_p11 }
 0x6a9   : > { %p742_p0 = pnand %p741_p13, %p735_p8 }
 0x6ab   : > { %745 = shalt.err (!%p742_p0)
}
 0x6ac   : > { %652 = dma.vmem_to_hbm [thread:$0]  (%p866_p5), %s936_s19, 16, %s934_s28, %s528_s29  }
 0x6ad PF: > { %p658_p1 = scmp.ge.s32.totalorder %s780_s24, 2  ;;  %s552_s18 = sand.u32 1, %s768_s21  }
 0x6ae   : > { %s553_s20 = scalar_lea.sflag [#allocation3], %s552_s18 }
 0x6af   : > { %p655_p2 = pnand %p658_p1, %p870_p6 }
 0x6b1   : > { %763 = dma.done.wait (!%p655_p2), %s553_s20, 16  }
 0x6b2   : > { %765 = vsyncadd (!%p655_p2), %s553_s20, 4294967280  ;;  %p16_p3 = scmp.ge.s32.totalorder %s853_s27, 4   ;;  %s985_s21 = smov %s772_s22 }
 0x6b3   : > { %s986_s22 = smov %s776_s23  ;;  %s987_s23 = smov %s864_s30 }
 0x6b4   : > { %s988_s24 = smov %s853_s27  ;;  %18 = sbr.rel (!%p16_p3) target bundleno = 3 (0x3), region = 82 }
 0x6bb   :  { %557 = vsyncpa [#allocation3], 1 }
 0x6bc   :  { %559 = vsyncpa [#allocation3 + $0x1], 1 }

</bundles_post_ra>
